<compile_context>
chip_gen: v7x
topology: tpu7x:2x2x1
jax: 0.10.0
libtpu: 0.0.40
codegen_flags: <defaults>
</compile_context>

<pallas_src>
import jax
import jax.numpy as jnp
from jax.experimental import pallas as pl
from jax.experimental.pallas import tpu as pltpu


def _round_up(x: int, m: int) -> int:
    return ((x + m - 1) // m) * m


# ----------------------------- kernels -------------------------------------- #

def _ffn_kernel_resident(x_ref, w1_ref, b1_ref, w2_ref, b2_ref, o_ref):
    # x_ref: (tm, dim) f32 | w1_ref: (dim, hidden) bf16 | b1_ref: (1, hidden) f32
    # w2_ref: (hidden, dim) bf16 | b2_ref: (1, dim) f32 | o_ref: (tm, dim)
    x = x_ref[...].astype(jnp.bfloat16)
    h = jnp.dot(x, w1_ref[...], preferred_element_type=jnp.float32) + b1_ref[...]
    # TODO(synk): PyTorch nn.GELU() defaults to exact (erf) GELU; the tanh
    # approximation is used for robust Mosaic lowering (~1e-3 divergence).
    h = jax.nn.gelu(h, approximate=True)
    y = jnp.dot(h.astype(jnp.bfloat16), w2_ref[...],
                preferred_element_type=jnp.float32) + b2_ref[...]
    o_ref[...] = y.astype(o_ref.dtype)


def _ffn_kernel_hidden_tiled(x_ref, w1_ref, b1_ref, w2_ref, b2_ref, o_ref, acc_ref):
    # Hidden dimension is tiled (grid axis 1, "arbitrary"): accumulate the
    # second matmul into an f32 VMEM scratch and write the output at the end.
    k = pl.program_id(1)

    @pl.when(k == 0)
    def _():
        acc_ref[...] = jnp.zeros_like(acc_ref)

    x = x_ref[...].astype(jnp.bfloat16)
    h = jnp.dot(x, w1_ref[...], preferred_element_type=jnp.float32) + b1_ref[...]
    h = jax.nn.gelu(h, approximate=True)           # elementwise -> per-tile OK
    acc_ref[...] += jnp.dot(h.astype(jnp.bfloat16), w2_ref[...],
                            preferred_element_type=jnp.float32)

    @pl.when(k == pl.num_programs(1) - 1)
    def _():
        o_ref[...] = (acc_ref[...] + b2_ref[...]).astype(o_ref.dtype)


# ----------------------------- sizing helpers -------------------------------- #

def _choose_hidden_tile(dim, hidden, budget_bytes):
    """Return `hidden` if bf16 weights fit fully VMEM-resident (single-buffered),
    else the largest multiple-of-128 divisor of `hidden` whose double-buffered
    (dim, th)/(th, dim) weight blocks fit the budget (v7x / huge-model path)."""
    bf16 = 2
    if 2 * dim * hidden * bf16 <= budget_bytes or hidden % 128 != 0:
        return hidden
    best = None
    for th in range(128, hidden, 128):
        if hidden % th != 0:
            continue
        if 2 * (2 * dim * th) * bf16 <= budget_bytes:   # double-buffered W1+W2 tiles
            best = th
    return best if best is not None else 128


def _vmem_limit_bytes(tm, dim, hidden, th, resident, x_bytes, o_bytes):
    f32, bf16 = 4, 2
    if resident:
        weights = 2 * dim * hidden * bf16             # W1 + W2, single-buffered
        biases = (hidden + dim) * f32
        inter = tm * hidden * (f32 + bf16)            # f32 h + bf16 copy
        scratch = 0
    else:
        weights = 2 * (dim * th + th * dim) * bf16    # double-buffered tiles
        biases = 2 * th * f32 + dim * f32
        inter = tm * th * (f32 + bf16)
        scratch = tm * dim * f32                      # accumulator
    act = 2 * tm * dim * (x_bytes + o_bytes)          # double-buffered x / out tiles
    need = weights + biases + inter + scratch + act
    return int(min(max(int(need * 1.5) + (4 << 20), 32 << 20), 128 << 20))


# ----------------------------- wrapper --------------------------------------- #

def feed_forward(x, w1, b1, w2, b2, *, row_tile=512, hidden_tile=None,
                 weight_budget_bytes=40 * 1024 * 1024):
    """FeedForward forward pass. x: (..., dim) -> (..., dim)."""
    orig_shape = x.shape
    dim = orig_shape[-1]
    hidden = w1.shape[-1]
    assert w1.shape == (dim, hidden) and w2.shape == (hidden, dim)

    # PyTorch nn.Linear biases are 1-D; present them as (1, N) lane-major rows.
    b1 = jnp.asarray(b1, jnp.float32).reshape(1, hidden)
    b2 = jnp.asarray(b2, jnp.float32).reshape(1, dim)
    # bf16 weights: native MXU input path, half the VMEM/HBM weight traffic.
    w1 = w1.astype(jnp.bfloat16)
    w2 = w2.astype(jnp.bfloat16)

    # Collapse all leading dims into the row (sublane) axis. No padding: the
    # grid uses cdiv and Pallas masks the ragged final block on writeback.
    m = 1
    for d in orig_shape[:-1]:
        m *= d
    x2 = x.reshape(m, dim)

    tm = min(row_tile, _round_up(m, 8))
    tm = max(8, _round_up(tm, 8))
    # v7x megacore: ensure >= 2 row steps (when possible) so the "parallel"
    # axis can be sharded across the 2 TensorCores.
    if pl.cdiv(m, tm) < 2 and m > 8:
        tm = _round_up(-(-m // 2), 8)
    n_rows = pl.cdiv(m, tm)

    th = hidden_tile if hidden_tile is not None else _choose_hidden_tile(
        dim, hidden, weight_budget_bytes)
    resident = (th >= hidden)

    x_bytes = jnp.dtype(x.dtype).itemsize
    o_bytes = x_bytes
    vmem_limit = _vmem_limit_bytes(tm, dim, hidden, th, resident, x_bytes, o_bytes)

    cost = pl.CostEstimate(
        flops=4 * m * dim * hidden,                       # two matmuls
        transcendentals=m * hidden,                        # GELU tanh
        bytes_accessed=(m * dim * (x_bytes + o_bytes)
                        + 2 * dim * hidden * 2            # bf16 weights
                        + (hidden + dim) * 4))

    def _make_call(single_buffer_consts):
        def const_spec(shape, index_map):
            if single_buffer_consts:
                # Constant-index blocks need no double buffer.
                return pl.BlockSpec(shape, index_map, pipeline_mode=pl.Buffered(1))
            return pl.BlockSpec(shape, index_map)

        if resident:
            grid = (n_rows,)
            in_specs = [
                pl.BlockSpec((tm, dim), lambda i: (i, 0)),       # activations
                const_spec((dim, hidden), lambda i: (0, 0)),     # W1 (resident)
                const_spec((1, hidden), lambda i: (0, 0)),       # b1
                const_spec((hidden, dim), lambda i: (0, 0)),     # W2 (resident)
                const_spec((1, dim), lambda i: (0, 0)),          # b2
            ]
            out_specs = pl.BlockSpec((tm, dim), lambda i: (i, 0))
            scratch = []
            kernel = _ffn_kernel_resident
            dim_sem = ("parallel",)
        else:
            grid = (n_rows, hidden // th)
            in_specs = [
                pl.BlockSpec((tm, dim), lambda i, k: (i, 0)),    # activations
                pl.BlockSpec((dim, th), lambda i, k: (0, k)),    # W1 tile
                pl.BlockSpec((1, th), lambda i, k: (0, k)),      # b1 tile
                pl.BlockSpec((th, dim), lambda i, k: (k, 0)),    # W2 tile
                const_spec((1, dim), lambda i, k: (0, 0)),       # b2
            ]
            out_specs = pl.BlockSpec((tm, dim), lambda i, k: (i, 0))
            scratch = [pltpu.VMEM((tm, dim), jnp.float32)]
            kernel = _ffn_kernel_hidden_tiled
            dim_sem = ("parallel", "arbitrary")

        return pl.pallas_call(
            kernel,
            out_shape=jax.ShapeDtypeStruct((m, dim), x.dtype),
            grid=grid,
            in_specs=in_specs,
            out_specs=out_specs,
            scratch_shapes=scratch,
            compiler_params=pltpu.CompilerParams(
                dimension_semantics=dim_sem,
                vmem_limit_bytes=vmem_limit),
            cost_estimate=cost,
        )

    args = (x2, w1, b1, w2, b2)
    try:
        out = _make_call(single_buffer_consts=True)(*args)
    except Exception:
        # pipeline_mode=pl.Buffered(1) not supported by this build; use defaults.
        out = _make_call(single_buffer_consts=False)(*args)

    return out.reshape(orig_shape)


# ----------------------------- params & reference ---------------------------- #

def init_params(key, dim, hidden_dim):
    k1, k2, k3, k4 = jax.random.split(key, 4)
    scale = 0.02
    return {
        "w1": (scale * jax.random.normal(k1, (dim, hidden_dim))).astype(jnp.float32),
        "b1": (scale * jax.random.normal(k2, (hidden_dim,))).astype(jnp.float32),
        "w2": (scale * jax.random.normal(k3, (hidden_dim, dim))).astype(jnp.float32),
        "b2": (scale * jax.random.normal(k4, (dim,))).astype(jnp.float32),
    }


def feed_forward_ref(x, w1, b1, w2, b2):
    """Pure-JAX reference mirroring the kernel's bf16-input / f32-accumulate path."""
    h = jnp.dot(x.astype(jnp.bfloat16), w1.astype(jnp.bfloat16),
                preferred_element_type=jnp.float32) + b1
    h = jax.nn.gelu(h, approximate=True)
    y = jnp.dot(h.astype(jnp.bfloat16), w2.astype(jnp.bfloat16),
                preferred_element_type=jnp.float32) + b2
    return y.astype(x.dtype)


# ----------------------------- main ------------------------------------------ #

if __name__ == "__main__":
    B, S, DIM, HIDDEN = 2, 16, 128, 256   # small, lane-aligned shapes

    key = jax.random.PRNGKey(0)
    k_x, k_p = jax.random.split(key)
    x = jax.random.normal(k_x, (B, S, DIM), dtype=jnp.float32)
    params = init_params(k_p, DIM, HIDDEN)

    ref = feed_forward_ref(x, params["w1"], params["b1"], params["w2"], params["b2"])

    # Path 1: fully VMEM-resident weights (default at small/ViT-Base scale).
    out = feed_forward(x, params["w1"], params["b1"], params["w2"], params["b2"])
    out = jax.block_until_ready(out)
    assert out.shape == (B, S, DIM), out.shape
    assert jnp.allclose(out, ref, atol=1e-3, rtol=1e-3), \
        float(jnp.max(jnp.abs(out - ref)))

    # Path 2: hidden-tiled accumulator fallback (used when weights exceed the
    # VMEM budget, e.g. ViT-Large/Huge on v7x's 64 MiB VMEM) -- forced here so
    # both code paths are compiled and checked.
    out_t = feed_forward(x, params["w1"], params["b1"], params["w2"], params["b2"],
                         hidden_tile=128)
    out_t = jax.block_until_ready(out_t)
    assert jnp.allclose(out_t, ref, atol=1e-3, rtol=1e-3), \
        float(jnp.max(jnp.abs(out_t - ref)))

    print("KERNEL_OK")
</pallas_src>

<mosaic_0001>
module attributes {stable_mosaic.version = 11 : i64} {
  func.func @_ffn_kernel_resident(%arg0: i32, %arg1: memref<16x128xf32, #tpu.memory_space<vmem>>, %arg2: memref<128x256xbf16, #tpu.memory_space<vmem>>, %arg3: memref<1x256xf32, #tpu.memory_space<vmem>>, %arg4: memref<256x128xbf16, #tpu.memory_space<vmem>>, %arg5: memref<1x128xf32, #tpu.memory_space<vmem>>, %arg6: memref<16x128xf32, #tpu.memory_space<vmem>>) attributes {dimension_semantics = [#tpu.dimension_semantics<parallel>], iteration_bounds = array<i64: 2>, scalar_prefetch = 0 : i64, scratch_operands = 0 : i64, tpu.core_type = #tpu.core_type<tc>, window_params = [{transform_indices = @transform_0, window_bounds = array<i64: 16, 128>}, {pipeline_mode = #tpu.pipeline_mode<synchronous>, transform_indices = @transform_1, window_bounds = array<i64: 128, 256>}, {pipeline_mode = #tpu.pipeline_mode<synchronous>, transform_indices = @transform_2, window_bounds = array<i64: 1, 256>}, {pipeline_mode = #tpu.pipeline_mode<synchronous>, transform_indices = @transform_3, window_bounds = array<i64: 256, 128>}, {pipeline_mode = #tpu.pipeline_mode<synchronous>, transform_indices = @transform_4, window_bounds = array<i64: 1, 128>}, {transform_indices = @transform_5, window_bounds = array<i64: 16, 128>}]} {
    %c0 = arith.constant 0 : index
    %c0_0 = arith.constant 0 : index
    %0 = vector.load %arg1[%c0, %c0_0] : memref<16x128xf32, #tpu.memory_space<vmem>>, vector<16x128xf32>
    %1 = arith.truncf %0 : vector<16x128xf32> to vector<16x128xbf16>
    %c0_1 = arith.constant 0 : index
    %c0_2 = arith.constant 0 : index
    %2 = vector.load %arg2[%c0_1, %c0_2] : memref<128x256xbf16, #tpu.memory_space<vmem>>, vector<128x256xbf16>
    %cst = arith.constant dense<0.000000e+00> : vector<16x256xf32>
    %3 = tpu.matmul %1, %2, %cst {dimension_numbers = #tpu.dot_dimension_numbers<[1], [0], [0], [1], [0, 0, 1, 1], [], []>} : vector<16x128xbf16>, vector<128x256xbf16>, vector<16x256xf32> -> vector<16x256xf32>
    %c0_3 = arith.constant 0 : index
    %c0_4 = arith.constant 0 : index
    %4 = vector.load %arg3[%c0_3, %c0_4] : memref<1x256xf32, #tpu.memory_space<vmem>>, vector<1x256xf32>
    %5 = vector.broadcast %4 : vector<1x256xf32> to vector<16x256xf32>
    %6 = arith.addf %3, %5 : vector<16x256xf32>
    %7 = arith.mulf %6, %6 : vector<16x256xf32>
    %8 = arith.mulf %6, %7 : vector<16x256xf32>
    %cst_5 = arith.constant 4.471500e-02 : f32
    %9 = vector.broadcast %cst_5 : f32 to vector<16x256xf32>
    %10 = arith.mulf %9, %8 : vector<16x256xf32>
    %11 = arith.addf %6, %10 : vector<16x256xf32>
    %cst_6 = arith.constant 0.797884583 : f32
    %12 = vector.broadcast %cst_6 : f32 to vector<16x256xf32>
    %13 = arith.mulf %12, %11 : vector<16x256xf32>
    %14 = math.tanh %13 : vector<16x256xf32>
    %cst_7 = arith.constant 1.000000e+00 : f32
    %15 = vector.broadcast %cst_7 : f32 to vector<16x256xf32>
    %16 = arith.addf %15, %14 : vector<16x256xf32>
    %cst_8 = arith.constant 5.000000e-01 : f32
    %17 = vector.broadcast %cst_8 : f32 to vector<16x256xf32>
    %18 = arith.mulf %17, %16 : vector<16x256xf32>
    %19 = arith.mulf %6, %18 : vector<16x256xf32>
    %20 = arith.truncf %19 : vector<16x256xf32> to vector<16x256xbf16>
    %c0_9 = arith.constant 0 : index
    %c0_10 = arith.constant 0 : index
    %21 = vector.load %arg4[%c0_9, %c0_10] : memref<256x128xbf16, #tpu.memory_space<vmem>>, vector<256x128xbf16>
    %cst_11 = arith.constant dense<0.000000e+00> : vector<16x128xf32>
    %22 = tpu.matmul %20, %21, %cst_11 {dimension_numbers = #tpu.dot_dimension_numbers<[1], [0], [0], [1], [0, 0, 1, 1], [], []>} : vector<16x256xbf16>, vector<256x128xbf16>, vector<16x128xf32> -> vector<16x128xf32>
    %c0_12 = arith.constant 0 : index
    %c0_13 = arith.constant 0 : index
    %23 = vector.load %arg5[%c0_12, %c0_13] : memref<1x128xf32, #tpu.memory_space<vmem>>, vector<1x128xf32>
    %24 = vector.broadcast %23 : vector<1x128xf32> to vector<16x128xf32>
    %25 = arith.addf %22, %24 : vector<16x128xf32>
    %c0_14 = arith.constant 0 : index
    %c0_15 = arith.constant 0 : index
    %26 = vector.load %arg6[%c0_14, %c0_15] : memref<16x128xf32, #tpu.memory_space<vmem>>, vector<16x128xf32>
    tpu.vector_store %arg6[%c0_14, %c0_15], %25 {strides = array<i32>} : memref<16x128xf32, #tpu.memory_space<vmem>>, vector<16x128xf32>,
    return
  }
  func.func @transform_0(%arg0: i32) -> (i32, i32) {
    %c0_i32 = arith.constant 0 : i32
    %c0_i32_0 = arith.constant 0 : i32
    return %arg0, %c0_i32 : i32, i32
  }
  func.func @transform_1(%arg0: i32) -> (i32, i32) {
    %c0_i32 = arith.constant 0 : i32
    %c0_i32_0 = arith.constant 0 : i32
    %c0_i32_1 = arith.constant 0 : i32
    return %c0_i32, %c0_i32_0 : i32, i32
  }
  func.func @transform_2(%arg0: i32) -> (i32, i32) {
    %c0_i32 = arith.constant 0 : i32
    %c0_i32_0 = arith.constant 0 : i32
    %c0_i32_1 = arith.constant 0 : i32
    return %c0_i32, %c0_i32_0 : i32, i32
  }
  func.func @transform_3(%arg0: i32) -> (i32, i32) {
    %c0_i32 = arith.constant 0 : i32
    %c0_i32_0 = arith.constant 0 : i32
    %c0_i32_1 = arith.constant 0 : i32
    return %c0_i32, %c0_i32_0 : i32, i32
  }
  func.func @transform_4(%arg0: i32) -> (i32, i32) {
    %c0_i32 = arith.constant 0 : i32
    %c0_i32_0 = arith.constant 0 : i32
    %c0_i32_1 = arith.constant 0 : i32
    return %c0_i32, %c0_i32_0 : i32, i32
  }
  func.func @transform_5(%arg0: i32) -> (i32, i32) {
    %c0_i32 = arith.constant 0 : i32
    %c0_i32_0 = arith.constant 0 : i32
    return %arg0, %c0_i32 : i32, i32
  }
}

module attributes {stable_mosaic.version = 11 : i64} {
  func.func @_ffn_kernel_resident(%arg0: i32, %arg1: memref<16x128xf32, #tpu.memory_space<vmem>>, %arg2: memref<128x256xbf16, #tpu.memory_space<vmem>>, %arg3: memref<1x256xf32, #tpu.memory_space<vmem>>, %arg4: memref<256x128xbf16, #tpu.memory_space<vmem>>, %arg5: memref<1x128xf32, #tpu.memory_space<vmem>>, %arg6: memref<16x128xf32, #tpu.memory_space<vmem>>) attributes {dimension_semantics = [#tpu.dimension_semantics<parallel>], iteration_bounds = array<i64: 2>, scalar_prefetch = 0 : i64, scratch_operands = 0 : i64, tpu.core_type = #tpu.core_type<tc>, window_params = [{transform_indices = @transform_0, window_bounds = array<i64: 16, 128>}, {pipeline_mode = #tpu.pipeline_mode<synchronous>, transform_indices = @transform_1, window_bounds = array<i64: 128, 256>}, {pipeline_mode = #tpu.pipeline_mode<synchronous>, transform_indices = @transform_2, window_bounds = array<i64: 1, 256>}, {pipeline_mode = #tpu.pipeline_mode<synchronous>, transform_indices = @transform_3, window_bounds = array<i64: 256, 128>}, {pipeline_mode = #tpu.pipeline_mode<synchronous>, transform_indices = @transform_4, window_bounds = array<i64: 1, 128>}, {transform_indices = @transform_5, window_bounds = array<i64: 16, 128>}]} {
    %c0 = arith.constant 0 : index
    %c0_0 = arith.constant 0 : index
    %0 = vector.load %arg1[%c0, %c0_0] : memref<16x128xf32, #tpu.memory_space<vmem>>, vector<16x128xf32>
    %1 = arith.truncf %0 : vector<16x128xf32> to vector<16x128xbf16>
    %c0_1 = arith.constant 0 : index
    %c0_2 = arith.constant 0 : index
    %2 = vector.load %arg2[%c0_1, %c0_2] : memref<128x256xbf16, #tpu.memory_space<vmem>>, vector<128x256xbf16>
    %cst = arith.constant dense<0.000000e+00> : vector<16x256xf32>
    %3 = tpu.matmul %1, %2, %cst {dimension_numbers = #tpu.dot_dimension_numbers<[1], [0], [0], [1], [0, 0, 1, 1], [], []>} : vector<16x128xbf16>, vector<128x256xbf16>, vector<16x256xf32> -> vector<16x256xf32>
    %c0_3 = arith.constant 0 : index
    %c0_4 = arith.constant 0 : index
    %4 = vector.load %arg3[%c0_3, %c0_4] : memref<1x256xf32, #tpu.memory_space<vmem>>, vector<1x256xf32>
    %5 = vector.broadcast %4 : vector<1x256xf32> to vector<16x256xf32>
    %6 = arith.addf %3, %5 : vector<16x256xf32>
    %7 = arith.mulf %6, %6 : vector<16x256xf32>
    %8 = arith.mulf %6, %7 : vector<16x256xf32>
    %cst_5 = arith.constant 4.471500e-02 : f32
    %9 = vector.broadcast %cst_5 : f32 to vector<16x256xf32>
    %10 = arith.mulf %9, %8 : vector<16x256xf32>
    %11 = arith.addf %6, %10 : vector<16x256xf32>
    %cst_6 = arith.constant 0.797884583 : f32
    %12 = vector.broadcast %cst_6 : f32 to vector<16x256xf32>
    %13 = arith.mulf %12, %11 : vector<16x256xf32>
    %14 = math.tanh %13 : vector<16x256xf32>
    %cst_7 = arith.constant 1.000000e+00 : f32
    %15 = vector.broadcast %cst_7 : f32 to vector<16x256xf32>
    %16 = arith.addf %15, %14 : vector<16x256xf32>
    %cst_8 = arith.constant 5.000000e-01 : f32
    %17 = vector.broadcast %cst_8 : f32 to vector<16x256xf32>
    %18 = arith.mulf %17, %16 : vector<16x256xf32>
    %19 = arith.mulf %6, %18 : vector<16x256xf32>
    %20 = arith.truncf %19 : vector<16x256xf32> to vector<16x256xbf16>
    %c0_9 = arith.constant 0 : index
    %c0_10 = arith.constant 0 : index
    %21 = vector.load %arg4[%c0_9, %c0_10] : memref<256x128xbf16, #tpu.memory_space<vmem>>, vector<256x128xbf16>
    %cst_11 = arith.constant dense<0.000000e+00> : vector<16x128xf32>
    %22 = tpu.matmul %20, %21, %cst_11 {dimension_numbers = #tpu.dot_dimension_numbers<[1], [0], [0], [1], [0, 0, 1, 1], [], []>} : vector<16x256xbf16>, vector<256x128xbf16>, vector<16x128xf32> -> vector<16x128xf32>
    %c0_12 = arith.constant 0 : index
    %c0_13 = arith.constant 0 : index
    %23 = vector.load %arg5[%c0_12, %c0_13] : memref<1x128xf32, #tpu.memory_space<vmem>>, vector<1x128xf32>
    %24 = vector.broadcast %23 : vector<1x128xf32> to vector<16x128xf32>
    %25 = arith.addf %22, %24 : vector<16x128xf32>
    %c0_14 = arith.constant 0 : index
    %c0_15 = arith.constant 0 : index
    %26 = vector.load %arg6[%c0_14, %c0_15] : memref<16x128xf32, #tpu.memory_space<vmem>>, vector<16x128xf32>
    tpu.vector_store %arg6[%c0_14, %c0_15], %25 {strides = array<i32>} : memref<16x128xf32, #tpu.memory_space<vmem>>, vector<16x128xf32>,
    return
  }
  func.func @transform_0(%arg0: i32) -> (i32, i32) {
    %c0_i32 = arith.constant 0 : i32
    %c0_i32_0 = arith.constant 0 : i32
    return %arg0, %c0_i32 : i32, i32
  }
  func.func @transform_1(%arg0: i32) -> (i32, i32) {
    %c0_i32 = arith.constant 0 : i32
    %c0_i32_0 = arith.constant 0 : i32
    %c0_i32_1 = arith.constant 0 : i32
    return %c0_i32, %c0_i32_0 : i32, i32
  }
  func.func @transform_2(%arg0: i32) -> (i32, i32) {
    %c0_i32 = arith.constant 0 : i32
    %c0_i32_0 = arith.constant 0 : i32
    %c0_i32_1 = arith.constant 0 : i32
    return %c0_i32, %c0_i32_0 : i32, i32
  }
  func.func @transform_3(%arg0: i32) -> (i32, i32) {
    %c0_i32 = arith.constant 0 : i32
    %c0_i32_0 = arith.constant 0 : i32
    %c0_i32_1 = arith.constant 0 : i32
    return %c0_i32, %c0_i32_0 : i32, i32
  }
  func.func @transform_4(%arg0: i32) -> (i32, i32) {
    %c0_i32 = arith.constant 0 : i32
    %c0_i32_0 = arith.constant 0 : i32
    %c0_i32_1 = arith.constant 0 : i32
    return %c0_i32, %c0_i32_0 : i32, i32
  }
  func.func @transform_5(%arg0: i32) -> (i32, i32) {
    %c0_i32 = arith.constant 0 : i32
    %c0_i32_0 = arith.constant 0 : i32
    return %arg0, %c0_i32 : i32, i32
  }
}

</mosaic_0001>

<bundles_post_ra>
// kernel: tpu_custom_call.1
= control target key start
LH: loop header
LB: loop body
LE: loop exit
PB: predicated region body
PF: predicated region fallthrough
CT: control target
= control target key end

     0   :  { %10 = vsyncpa [#allocation3], 0  ;;  %s1401_s0 = inlined_call_operand.hbm [shape: f32[32,128], index: 0, kind: input, shape index: {}]   ;;  %s1402_s1 = inlined_call_operand.hbm [shape: bf16[128,256], index: 1, kind: input, shape index: {}]   ;;  %s1403_s2 = inlined_call_operand.vmem [shape: f32[1,256], index: 2, kind: input, shape index: {}]   ;;  %s1404_s3 = inlined_call_operand.hbm [shape: bf16[256,128], index: 3, kind: input, shape index: {}]   ;;  %s1405_s4 = inlined_call_operand.vmem [shape: f32[1,128], index: 4, kind: input, shape index: {}]   ;;  %s1406_s5 = inlined_call_operand.hbm [shape: f32[32,128], index: 5, kind: output, shape index: {}]  }
   0x1   :  { %12 = vsyncpa [#allocation3 + $0x1], 0 }
   0x2   :  { %13 = vsyncpa [#allocation6], 0 }
   0x3   :  { %14 = vsyncpa [#allocation4], 0 }
   0x4   :  { %16 = vsyncpa [#allocation4 + $0x1], 0  ;;  %s1147_s18 = smov 0   ;;  %s1149_s19 = smov 0  }
   0x5   :  { %s1151_s20 = smov 0   ;;  %s1153_s21 = smov 0  }
   0x6 LB: > { %s1168_s22 = sadd.s32 4294967295, %s1104_s21   ;;  %s751_s23 = sadd.s32 4294967294, %s1104_s21   ;;  %s1104_s21 = sphi %s1153_s21, %s1426_s21   ;;  %s1100_s20 = sphi %s1151_s20, %s1425_s20   ;;  %s1096_s19 = sphi %s1149_s19, %s1424_s19   ;;  %s1092_s18 = sphi %s1147_s18, %s1423_s18  }
   0x7   : > { %p42_p0 = scmp.ne.s32.totalorder %s1096_s19, %s1092_s18  ;;  %p1407_p1 = scmp.eq.s32.totalorder %s1168_s22, 0 }
   0x8   : > { %p156_p3 = scmp.eq.s32.totalorder %s751_s23, 1  ;;  %p752_p5 = scmp.ge.s32.totalorder %s1104_s21, 1 }
   0x9   : > { %p1177_p4 = por %p1407_p1, %p42_p0  ;;  %p163_p7 = scmp.lt.s32.totalorder %s1104_s21, 3 }
   0xa   : > { %p1182_p6 = por %p156_p3, %p42_p0  ;;  %s1106_s27 = smov [#allocation5]  }
   0xb   : > { %s1410_s24 = scalar_select %p1177_p4, 1, 0 }
   0xc   : > { %s1411_s25 = scalar_select %p1182_p6, 1, 0 }
   0xd   : > { %p1187_p8 = pnand %p752_p5, %p163_p7  ;;  %s175_s28 = sshll.u32 %s1106_s27, 4  ;;  %s1191_s28 = int_to_ptr.vmem [resolvable:$true] %s175_s28 }
   0xe   : > { %s1107_s30 = smov [#allocation7]   ;;  %s948_s9 = scalar_lea.hbm %s1402_s1, 2048 }
   0xf   : > { %p838_p9 = pneg %p1187_p8  ;;  %s191_s6 = sshll.u32 %s1107_s30, 4  ;;  %s1202_s6 = int_to_ptr.vmem [resolvable:$true] %s191_s6 }
  0x10   : > { %p949_p12 = scmp.ne.s32.totalorder %s1402_s1, %s948_s9  ;;  %p955_p5 = scmp.lt.u32.totalorder %s948_s9, %s1402_s1 }
  0x11   : > { %p1198_p11 = pnand %p838_p9, %p1407_p1 }
  0x13   : > { %p950_p13 = pneg %p1198_p11 }
  0x15   : > { %p951_p0 = pnand %p950_p13, %p949_p12 }
  0x17   : > { %p952_p3 = pneg %p951_p0 }
  0x19   : > { %p957_p7 = pnand %p955_p5, %p952_p3 }
  0x1b   : > { %960 = shalt.err (!%p957_p7)
}
  0x1c   : > { %s961_s14 = scalar_lea.vmem %s1191_s28, 2048  ;;  %p969_p2 = scmp.lt.s32.totalorder %s1191_s28, %s1191_s28 }
  0x1d   : > { %p962_p9 = scmp.ne.s32.totalorder %s1191_s28, %s961_s14  ;;  %p970_p12 = scmp.lt.s32.totalorder %s961_s14, %s961_s14 }
  0x1f   : > { %p964_p10 = pnand %p962_p9, %p950_p13  ;;  %p971_p0 = por %p970_p12, %p969_p2 }
  0x21   : > { %p965_p1 = pneg %p964_p10 }
  0x23   : > { %p972_p6 = pnand %p971_p0, %p965_p1 }
  0x25   : > { %975 = shalt.err (!%p972_p6)
}
  0x26   : > { %s1108_s15 = smov 128   ;;  %s1109_s16 = smov 8  }
  0x27   : > { %841 = dma.hbm_to_vmem [thread:$0]  (!%p1198_p11), %s1402_s1, 2048, %s1191_s28, [#allocation6], %s1108_s15, %s1108_s15, %s1109_s16  }
  0x28   : > { %s976_s7 = scalar_lea.hbm %s1404_s3, 2048 }
  0x29   : > { %p977_p1 = scmp.ne.s32.totalorder %s1404_s3, %s976_s7  ;;  %p983_p10 = scmp.lt.u32.totalorder %s976_s7, %s1404_s3 }
  0x2b   : > { %p979_p2 = pnand %p977_p1, %p950_p13 }
  0x2d   : > { %p980_p6 = pneg %p979_p2 }
  0x2f   : > { %p985_p3 = pnand %p983_p10, %p980_p6 }
  0x31   : > { %988 = shalt.err (!%p985_p3)
}
  0x32   : > { %s989_s28 = scalar_lea.vmem %s1202_s6, 2048  ;;  %p997_p12 = scmp.lt.s32.totalorder %s1202_s6, %s1202_s6 }
  0x33   : > { %p990_p5 = scmp.ne.s32.totalorder %s1202_s6, %s989_s28  ;;  %p998_p0 = scmp.lt.s32.totalorder %s989_s28, %s989_s28 }
  0x35   : > { %p992_p7 = pnand %p990_p5, %p950_p13  ;;  %p999_p1 = por %p998_p0, %p997_p12 }
  0x37   : > { %p993_p9 = pneg %p992_p7 }
  0x39   : > { %p1000_p2 = pnand %p999_p1, %p993_p9 }
  0x3b   : > { %1003 = shalt.err (!%p1000_p2)
}
  0x3c   : > { %s1110_s12 = smov 64   ;;  %s1111_s13 = smov 4  }
  0x3d   : > { %844 = dma.hbm_to_vmem [thread:$0]  (!%p1198_p11), %s1404_s3, 2048, %s1202_s6, [#allocation6], %s1110_s12, %s1110_s12, %s1111_s13  }
  0x3e   : > { %s1260_s23 = sadd.s32 1, %s1104_s21   ;;  %s29_s30 = sadd.s32 1, %s1100_s20 }
  0x3f   : > { %s26_s27 = ssub.s32 %s1104_s21, %s1260_s23  ;;  %p36_p6 = scmp.ne.s32.totalorder %s1100_s20, %s1096_s19 }
  0x40   : > { %p27_p13 = scmp.eq.s32.totalorder %s26_s27, 0  ;;  %p37_p10 = scmp.eq.s32.totalorder %s1104_s21, 0 }
  0x41   : > { %p1414_p5 = scmp.eq.s32.totalorder %s1168_s22, 1  ;;  %p855_p9 = scmp.lt.s32.totalorder %s1104_s21, 2 }
  0x42   : > { %s1269_s7 = scalar_select %p27_p13, %s1100_s20, %s29_s30  }
  0x43   : > { %p38_p3 = por %p37_p10, %p36_p6  ;;  %p1273_p7 = por %p1414_p5, %p36_p6 }
  0x44   : > { %s208_s29 = sand.u32 1, %s1100_s20   ;;  %s802_s6 = sshll.u32 %s1104_s21, 8 }
  0x45   : > { %s1415_s8 = scalar_select %p1273_p7, 1, 0 }
  0x46   : > { %s756_s9 = sshll.u32 %s208_s29, 4  ;;  %s1283_s28 = scalar_lea.hbm %s1401_s0, %s802_s6 }
  0x47   : > { %s212_s12 = scalar_lea.vmem [#allocation2], %s756_s9  ;;  %p1287_p11 = pnand %p855_p9, %p38_p3 }
  0x48   : > { %s219_s13 = sshll.u32 %s212_s12, 4  ;;  %s1291_s17 = scalar_lea.sflag [#allocation3], %s208_s29  ;;  %s1285_s13 = int_to_ptr.vmem [resolvable:$true] %s219_s13 }
  0x49   : > { %s1004_s27 = scalar_lea.hbm %s1283_s28, 256  ;;  %p1006_p0 = pneg %p1287_p11 }
  0x4a   : > { %p1005_p12 = scmp.ne.s32.totalorder %s1283_s28, %s1004_s27  ;;  %s1009_s6 = scalar_lea.hbm %s1401_s0, 512 }
  0x4b   : > { %p1010_p13 = scmp.lt.u32.totalorder %s1283_s28, %s1401_s0  ;;  %p1011_p6 = scmp.lt.u32.totalorder %s1009_s6, %s1004_s27 }
  0x4c   : > { %p1007_p1 = pnand %p1006_p0, %p1005_p12  ;;  %p1013_p3 = scmp.lt.u32.totalorder %s1004_s27, %s1283_s28 }
  0x4d   : > { %p1012_p10 = por %p1011_p6, %p1010_p13 }
  0x4e   : > { %p1008_p2 = pneg %p1007_p1 }
  0x4f   : > { %p1014_p5 = por %p1013_p3, %p1012_p10 }
  0x51   : > { %p1015_p9 = pnand %p1014_p5, %p1008_p2 }
  0x53   : > { %1018 = shalt.err (!%p1015_p9)
}
  0x54   : > { %s1019_s29 = scalar_lea.vmem %s1285_s13, 256  ;;  %s1112_s12 = smov [#allocation2]  }
  0x55   : > { %p1020_p12 = scmp.ne.s32.totalorder %s1285_s13, %s1019_s29  ;;  %s1024_s30 = sshll.u32 %s1112_s12, 4  ;;  %s1025_s30 = int_to_ptr.vmem [resolvable:$false] %s1024_s30 }
  0x56   : > { %s1026_s9 = scalar_lea.vmem %s1025_s30, 512  ;;  %p1027_p4 = scmp.lt.s32.totalorder %s1285_s13, %s1025_s30 }
  0x57   : > { %p1022_p1 = pnand %p1020_p12, %p1006_p0  ;;  %p1028_p13 = scmp.lt.s32.totalorder %s1026_s9, %s1019_s29 }
  0x59   : > { %p1023_p7 = pneg %p1022_p1  ;;  %p1029_p6 = por %p1028_p13, %p1027_p4 }
  0x5b   : > { %p1030_p10 = pnand %p1029_p6, %p1023_p7 }
  0x5d   : > { %1033 = shalt.err (!%p1030_p10)
}
  0x5e   : > { %848 = dma.hbm_to_vmem [thread:$0]  (!%p1287_p11), %s1283_s28, 256, %s1285_s13, %s1291_s17, %s1108_s15, %s1108_s15, %s1109_s16  }
  0x5f   : > { %231 = sbr.rel (%p1187_p8) target bundleno = 620 (0x26c), region = 40  ;;  %s1325_s27 = sand.u32 (!%p1187_p8), 1, %s1096_s19  }
  0x60   : > { %s760_s6 = sshll.u32 (!%p1187_p8), %s1325_s27, 4  ;;  %s234_s10 = scalar_lea.sflag (!%p1187_p8), [#allocation3], %s1325_s27 }
  0x61   : > { %s1331_s14 = scalar_lea.vmem (!%p1187_p8), [#allocation2], %s760_s6  ;;  %p1417_p4 = scmp.ne.s32.totalorder (!%p1187_p8), %s1410_s24, 0 }
  0x66   : > { %1079 = dma.done.wait (%p1417_p4), %s234_s10, 256  }
  0x67   : > { %1081 = vsyncadd (%p1417_p4), %s234_s10, 4294967040  ;;  %p1418_p7 = scmp.eq.s32.totalorder %s1168_s22, 0 }
  0x69   : > { %1083 = dma.done.wait (%p1418_p7), [#allocation6], 4096   ;;  %p1419_p8 = pmov %p1418_p7 }
  0x6a   : > { %v1113_v0 = vmov 0   ;;  %v900_v1 = vld [vmem:[#allocation5 + $0x4] ss:$8 sps:$4 sm:$0xff]   ;;  %v902_v2 = vld [vmem:[#allocation5] ss:$8 sps:$4 sm:$0xff]   ;;  %v928_v24 = vld [vmem:[#allocation7 + $0x50] sm:$0xff]   ;;  %v296_v36 = vlaneseq }
  0x6b   : > { %1085 = vsyncadd (%p1419_p8), [#allocation6], 4294963200  ;;  %418 = vmatprep.mubr.bf16.mxu0 %v1113_v0  ;;  %386 = vmatprep.subr.bf16.mxu0 %v900_v1  ;;  %v903_v3 = vld [vmem:[#allocation5 + $0x14] ss:$8 sps:$4 sm:$0xff]   ;;  %v905_v4 = vld [vmem:[#allocation5 + $0x10] ss:$8 sps:$4 sm:$0xff]  }
  0x6c   : > { %387 = vmatpush1.bf16.msra.mxu0 %v902_v2  ;;  %v906_v5 = vld [vmem:[#allocation5 + $0x24] ss:$8 sps:$4 sm:$0xff]   ;;  %v908_v6 = vld [vmem:[#allocation5 + $0x20] ss:$8 sps:$4 sm:$0xff]   ;;  %v909_v7 = vld [vmem:[#allocation5 + $0x34] ss:$8 sps:$4 sm:$0xff]  }
  0x6d   : > { %388 = vmatprep.subr.bf16.mxu0 %v903_v3  ;;  %v911_v8 = vld [vmem:[#allocation5 + $0x30] ss:$8 sps:$4 sm:$0xff]   ;;  %v912_v9 = vld [vmem:[#allocation5 + $0x44] ss:$8 sps:$4 sm:$0xff]   ;;  %v914_v10 = vld [vmem:[#allocation5 + $0x40] ss:$8 sps:$4 sm:$0xff]  }
  0x6e   : > { %v915_v11 = vld [vmem:[#allocation5 + $0x54] ss:$8 sps:$4 sm:$0xff]   ;;  %v917_v12 = vld [vmem:[#allocation5 + $0x50] ss:$8 sps:$4 sm:$0xff]   ;;  %v918_v13 = vld [vmem:[#allocation5 + $0x64] ss:$8 sps:$4 sm:$0xff]  }
  0x6f   : > { %v920_v14 = vld [vmem:[#allocation5 + $0x60] ss:$8 sps:$4 sm:$0xff]   ;;  %v921_v15 = vld [vmem:[#allocation5 + $0x74] ss:$8 sps:$4 sm:$0xff]   ;;  %v923_v16 = vld [vmem:[#allocation5 + $0x70] ss:$8 sps:$4 sm:$0xff]  }
  0x70   : > { %389 = vmatpush1.bf16.msra.mxu0 %v905_v4  ;;  %v275_v17 = vld [vmem:[%s1331_s14] sm:$0xff]  ;;  %v276_v18 = vld [vmem:[%s1331_s14 + $0x8] sm:$0xff]  ;;  %v297_v37 = vshrl.u32 %v296_v36, 7  ;;  %s271_s28 = scalar_lea.vmem [#allocation8], %s760_s6  ;;  %s803_s17 = sshll.u32 %s1168_s22, 8 }
  0x71   : > { %390 = vmatprep.subr.bf16.mxu0 %v906_v5  ;;  %v277_v19 = vpack.c.bf16 %v276_v18, %v275_v17  ;;  %v924_v20 = vld [vmem:[#allocation7 + $0x40] sm:$0xff]   ;;  %v926_v22 = vld [vmem:[#allocation7 + $0x48] sm:$0xff]   ;;  %v929_v25 = vld [vmem:[#allocation7 + $0x10] sm:$0xff]   ;;  %s659_s13 = sshll.u32 %s271_s28, 4  ;;  %s1357_s12 = scalar_lea.hbm %s1406_s5, %s803_s17  ;;  %s1352_s13 = int_to_ptr.vmem [resolvable:$true] %s659_s13 }
  0x72   : > { %v925_v21 = vld [vmem:[#allocation7] sm:$0xff]   ;;  %804 = vmatprep.subr.bf16.mxu1 %v924_v20  ;;  %v927_v23 = vld [vmem:[#allocation7 + $0x8] sm:$0xff]   ;;  %v930_v26 = vld [vmem:[#allocation7 + $0x58] sm:$0xff]   ;;  %v298_v38 = vsub.s32 0, %v297_v37  ;;  %v302_v40 = vsub.s32 1, %v297_v37  ;;  %s646_s30 = scalar_lea.sflag [#allocation4], %s1325_s27 }
  0x73   : > { %805 = vmatpush3.bf16.msra.mxu1 %v925_v21  ;;  %v931_v27 = vld [vmem:[#allocation7 + $0x18] sm:$0xff]   ;;  %v932_v28 = vld [vmem:[#allocation7 + $0x60] sm:$0xff]   ;;  %v934_v30 = vld [vmem:[#allocation7 + $0x68] sm:$0xff]   ;;  %s1034_s9 = scalar_lea.vmem %s1352_s13, 256  ;;  %p1420_p0 = scmp.ne.s32.totalorder %s1415_s8, 0 }
  0x74   : > { %391 = vmatpush1.bf16.msra.mxu0 %v908_v6  ;;  %806 = vmatprep.subr.bf16.mxu1 %v926_v22  ;;  %v933_v29 = vld [vmem:[#allocation7 + $0x20] sm:$0xff]   ;;  %v935_v31 = vld [vmem:[#allocation7 + $0x28] sm:$0xff]   ;;  %v936_v32 = vld [vmem:[#allocation7 + $0x70] sm:$0xff]   ;;  %p1035_p11 = scmp.ne.s32.totalorder %s1352_s13, %s1034_s9  ;;  %s1114_s22 = smov [#allocation8]  }
  0x75   : > { %392 = vmatprep.subr.bf16.mxu0 %v909_v7  ;;  %v937_v33 = vld [vmem:[#allocation7 + $0x30] sm:$0xff]   ;;  %v938_v34 = vld [vmem:[#allocation7 + $0x78] sm:$0xff]   ;;  %v294_v39 = vld [vmem:[%s1403_s2] sm:$0x3]  ;;  %s1038_s6 = sshll.u32 %s1114_s22, 4  ;;  %s1039_s6 = int_to_ptr.vmem [resolvable:$false] %s1038_s6 }
  0x76   : > { %v939_v35 = vld [vmem:[#allocation7 + $0x38] sm:$0xff]   ;;  %v299_v41 = vrot.slane %v294_v39, %v298_v38  ;;  %v303_v42 = vrot.slane %v294_v39, %v302_v40  ;;  %p1036_p2 = pnand %p1035_p11, %p1420_p0  ;;  %s1040_s10 = scalar_lea.vmem %s1039_s6, 512 }
  0x77   : > { %807 = vmatpush3.bf16.msra.mxu1 %v927_v23  ;;  %p1041_p5 = scmp.lt.s32.totalorder %s1352_s13, %s1039_s6  ;;  %p1042_p9 = scmp.lt.s32.totalorder %s1040_s10, %s1034_s9 }
  0x78   : > { %393 = vmatpush1.bf16.msra.mxu0 %v911_v8  ;;  %808 = vmatprep.subr.bf16.mxu1 %v928_v24  ;;  %p1037_p3 = pneg %p1036_p2 }
  0x79   : > { %394 = vmatprep.subr.bf16.mxu0 %v912_v9  ;;  %p1043_p12 = por %p1042_p9, %p1041_p5 }
  0x7b   : > { %809 = vmatpush3.bf16.msra.mxu1 %v929_v25  ;;  %p1044_p1 = pnand %p1043_p12, %p1037_p3 }
  0x7c   : > { %395 = vmatpush1.bf16.msra.mxu0 %v914_v10  ;;  %810 = vmatprep.subr.bf16.mxu1 %v930_v26  ;;  %v780_v26 = vld [vmem:[%s1405_s4] ss:$0 sm:$0xff] }
  0x7d   : > { %396 = vmatprep.subr.bf16.mxu0 %v915_v11 }
  0x7f   : > { %811 = vmatpush3.bf16.msra.mxu1 %v931_v27 }
  0x80   : > { %397 = vmatpush1.bf16.msra.mxu0 %v917_v12  ;;  %812 = vmatprep.subr.bf16.mxu1 %v932_v28 }
  0x81   : > { %398 = vmatprep.subr.bf16.mxu0 %v918_v13 }
  0x83   : > { %813 = vmatpush3.bf16.msra.mxu1 %v933_v29 }
  0x84   : > { %399 = vmatpush1.bf16.msra.mxu0 %v920_v14  ;;  %814 = vmatprep.subr.bf16.mxu1 %v934_v30 }
  0x85   : > { %400 = vmatprep.subr.bf16.mxu0 %v921_v15 }
  0x87   : > { %815 = vmatpush3.bf16.msra.mxu1 %v935_v31 }
  0x88   : > { %401 = vmatpush1.bf16.msra.mxu0 %v923_v16  ;;  %816 = vmatprep.subr.bf16.mxu1 %v936_v32 }
  0x8b   : > { %419 = vmatmul.mubr.bf16.vlgmr.msra.gmra.mrb[0].mxu0 %v277_v19  ;;  %817 = vmatpush3.bf16.msra.mxu1 %v937_v33 }
  0x8c   : > { %818 = vmatprep.subr.bf16.mxu1 %v938_v34 }
  0x8f   : > { %819 = vmatpush3.bf16.msra.mxu1 %v939_v35 }
 0x15e   : > { %v420_v43 = vpop.f32.mrb[0].mxu0 }
 0x15f   : > { %v421_v44 = vadd.f32 %v420_v43, %v299_v41  ;;  %v422_v45 = vpop.f32.mrb[1].mxu0 }
 0x160   : > { %v423_v46 = vadd.f32 %v422_v45, %v303_v42  ;;  %v424_v47 = vpop.f32.mrb[2].mxu0 }
 0x161   : > { %v429_v48 = vmul.f32 %v421_v44, %v421_v44  ;;  %v425_v49 = vadd.f32 %v424_v47, %v299_v41  ;;  %v426_v50 = vpop.f32.mrb[3].mxu0 }
 0x162   : > { %v430_v51 = vmul.f32 %v423_v46, %v423_v46  ;;  %v427_v52 = vadd.f32 %v426_v50, %v303_v42 }
 0x163   : > { %v433_v53 = vmul.f32 %v429_v48, %v421_v44  ;;  %v431_v54 = vmul.f32 %v425_v49, %v425_v49 }
 0x164   : > { %v434_v55 = vmul.f32 %v430_v51, %v423_v46  ;;  %v432_v56 = vmul.f32 %v427_v52, %v427_v52 }
 0x165   : > { %v437_v57 = vmul.f32 0.044715, %v433_v53  ;;  %v435_v58 = vmul.f32 %v431_v54, %v425_v49 }
 0x166   : > { %v438_v59 = vmul.f32 0.044715, %v434_v55  ;;  %v436_v60 = vmul.f32 %v432_v56, %v427_v52 }
 0x167   : > { %v441_v61 = vadd.f32 %v437_v57, %v421_v44  ;;  %v439_v62 = vmul.f32 0.044715, %v435_v58 }
 0x168   : > { %v440_v63 = vmul.f32 0.044715, %v436_v60  ;;  %v442_v0 = vadd.f32 %v438_v59, %v423_v46 }
 0x169   : > { %v445_v1 = vmul.f32 0.7978846, %v441_v61  ;;  %v443_v2 = vadd.f32 %v439_v62, %v425_v49 }
 0x16a   : > { %v444_v3 = vadd.f32 %v440_v63, %v427_v52  ;;  %v446_v4 = vmul.f32 0.7978846, %v442_v0 }
 0x16b   : > { %940 = vtanh.f32 %v445_v1  ;;  %v447_v5 = vmul.f32 0.7978846, %v443_v2 }
 0x16c   : > { %v448_v6 = vmul.f32 0.7978846, %v444_v3  ;;  %942 = vtanh.f32 %v446_v4 }
 0x16d   : > { %944 = vtanh.f32 %v447_v5 }
 0x16e   : > { %946 = vtanh.f32 %v448_v6 }
 0x175   : > { %v941_v7 = vpop.eup %940 }
 0x176   : > { %v943_v8 = vpop.eup %942  ;;  %v453_v9 = vadd.f32 1.0, %v941_v7 }
 0x177   : > { %v945_v10 = vpop.eup %944  ;;  %v454_v11 = vadd.f32 1.0, %v943_v8 }
 0x178   : > { %v947_v12 = vpop.eup %946  ;;  %v455_v13 = vadd.f32 1.0, %v945_v10  ;;  %v457_v14 = vmul.f32 0.5, %v453_v9 }
 0x179   : > { %v456_v15 = vadd.f32 1.0, %v947_v12  ;;  %v458_v16 = vmul.f32 0.5, %v454_v11 }
 0x17a   : > { %v459_v17 = vmul.f32 0.5, %v455_v13  ;;  %v461_v19 = vmul.f32 %v457_v14, %v421_v44 }
 0x17b   : > { %v460_v18 = vmul.f32 0.5, %v456_v15  ;;  %v462_v21 = vmul.f32 %v458_v16, %v423_v46 }
 0x17c   : > { %v463_v20 = vmul.f32 %v459_v17, %v425_v49 }
 0x17d   : > { %v464_v22 = vmul.f32 %v460_v18, %v427_v52 }
 0x17e   : > { %v465_v23 = vpack.c.bf16 %v463_v20, %v461_v19 }
 0x17f   : > { %v466_v24 = vpack.c.bf16 %v464_v22, %v462_v21 }
 0x181   : > { %634 = vmatprep.mubr.bf16.mxu1 %v466_v24 }
 0x182   : > { %635 = vmatmul.mubr.bf16.vlgmr.msra.gmra.mrb[0].mxu1 %v465_v23 }
 0x255   : > { %v820_v25 = vpop.f32.mrb[0].mxu1 }
 0x256   : > { %v821_v27 = vpop.f32.mrb[1].mxu1 }
 0x257   : > { %v822_v28 = vadd.f32 %v821_v27, %v820_v25  ;;  %v823_v29 = vpop.f32.mrb[2].mxu1 }
 0x258   : > { %v824_v30 = vpop.f32.mrb[3].mxu1 }
 0x259   : > { %v637_v31 = vadd.f32 %v822_v28, %v780_v26  ;;  %v825_v32 = vadd.f32 %v824_v30, %v823_v29 }
 0x25b   : > { %643 = vst [vmem:[%s271_s28] sm:$0xff] %v637_v31  ;;  %v640_v33 = vadd.f32 %v825_v32, %v780_v26 }
 0x25d   : > { %644 = vst [vmem:[%s271_s28 + $0x8] sm:$0xff] %v640_v33 }
 0x25e   : > { %1047 = shalt.err (!%p1044_p1)
}
 0x25f   : > { %s1048_s14 = scalar_lea.hbm %s1357_s12, 256  ;;  %s1052_s15 = scalar_lea.hbm %s1406_s5, 512 }
 0x260   : > { %p1049_p13 = scmp.ne.s32.totalorder %s1357_s12, %s1048_s14  ;;  %p1053_p4 = scmp.lt.u32.totalorder %s1357_s12, %s1406_s5 }
 0x261   : > { %p1054_p7 = scmp.lt.u32.totalorder %s1052_s15, %s1048_s14  ;;  %p1056_p11 = scmp.lt.u32.totalorder %s1048_s14, %s1357_s12 }
 0x262   : > { %p1050_p6 = pnand %p1049_p13, %p1420_p0 }
 0x263   : > { %p1055_p8 = por %p1054_p7, %p1053_p4 }
 0x264   : > { %p1051_p10 = pneg %p1050_p6 }
 0x265   : > { %p1057_p2 = por %p1056_p11, %p1055_p8 }
 0x267   : > { %p1058_p3 = pnand %p1057_p2, %p1051_p10 }
 0x269   : > { %1061 = shalt.err (!%p1058_p3)
}
 0x26a   : > { %s1115_s17 = smov 128   ;;  %s1116_s11 = smov 8  }
 0x26b   : > { %836 = dma.vmem_to_hbm [thread:$0]  (%p1420_p0), %s1352_s13, 256, %s1357_s12, %s646_s30, %s1115_s17, %s1115_s17, %s1116_s11  }
 0x26c PF: > { %s674_s29 = sand.u32 1, %s1092_s18   ;;  %p1421_p5 = scmp.ne.s32.totalorder %s1411_s25, 0 }
 0x26d   : > { %p1422_p9 = scmp.ge.s32.totalorder %s1104_s21, 2  ;;  %s675_s9 = scalar_lea.sflag [#allocation4], %s674_s29 }
 0x26f   : > { %p850_p12 = pnand %p1422_p9, %p1421_p5 }
 0x271   : > { %1087 = dma.done.wait (!%p850_p12), %s675_s9, 256  }
 0x272   : > { %1089 = vsyncadd (!%p850_p12), %s675_s9, 4294967040  ;;  %p19_p1 = scmp.ge.s32.totalorder %s1260_s23, 4   ;;  %s1423_s18 = smov %s1096_s19 }
 0x273   : > { %s1424_s19 = smov %s1100_s20  ;;  %s1425_s20 = smov %s1269_s7 }
 0x274   : > { %s1426_s21 = smov %s1260_s23  ;;  %21 = sbr.rel (!%p19_p1) target bundleno = 6 (0x6), region = 93 }
 0x27b   :  { %680 = vsyncpa [#allocation3], 1 }
 0x27c   :  { %682 = vsyncpa [#allocation3 + $0x1], 1 }
 0x27d   :  { %683 = vsyncpa [#allocation6], 1 }
 0x27e   :  { %684 = vsyncpa [#allocation4], 1 }
 0x27f   :  { %686 = vsyncpa [#allocation4 + $0x1], 1 }

// kernel: tpu_custom_call.1
= control target key start
LH: loop header
LB: loop body
LE: loop exit
PB: predicated region body
PF: predicated region fallthrough
CT: control target
= control target key end

     0   :  { %10 = vsyncpa [#allocation3], 0  ;;  %s1401_s0 = inlined_call_operand.hbm [shape: f32[32,128], index: 0, kind: input, shape index: {}]   ;;  %s1402_s1 = inlined_call_operand.hbm [shape: bf16[128,256], index: 1, kind: input, shape index: {}]   ;;  %s1403_s2 = inlined_call_operand.vmem [shape: f32[1,256], index: 2, kind: input, shape index: {}]   ;;  %s1404_s3 = inlined_call_operand.hbm [shape: bf16[256,128], index: 3, kind: input, shape index: {}]   ;;  %s1405_s4 = inlined_call_operand.vmem [shape: f32[1,128], index: 4, kind: input, shape index: {}]   ;;  %s1406_s5 = inlined_call_operand.hbm [shape: f32[32,128], index: 5, kind: output, shape index: {}]  }
   0x1   :  { %12 = vsyncpa [#allocation3 + $0x1], 0 }
   0x2   :  { %13 = vsyncpa [#allocation6], 0 }
   0x3   :  { %14 = vsyncpa [#allocation4], 0 }
   0x4   :  { %16 = vsyncpa [#allocation4 + $0x1], 0  ;;  %s1147_s18 = smov 0   ;;  %s1149_s19 = smov 0  }
   0x5   :  { %s1151_s20 = smov 0   ;;  %s1153_s21 = smov 0  }
   0x6 LB: > { %s1168_s22 = sadd.s32 4294967295, %s1104_s21   ;;  %s751_s23 = sadd.s32 4294967294, %s1104_s21   ;;  %s1104_s21 = sphi %s1153_s21, %s1426_s21   ;;  %s1100_s20 = sphi %s1151_s20, %s1425_s20   ;;  %s1096_s19 = sphi %s1149_s19, %s1424_s19   ;;  %s1092_s18 = sphi %s1147_s18, %s1423_s18  }
   0x7   : > { %p42_p0 = scmp.ne.s32.totalorder %s1096_s19, %s1092_s18  ;;  %p1407_p1 = scmp.eq.s32.totalorder %s1168_s22, 0 }
   0x8   : > { %p156_p3 = scmp.eq.s32.totalorder %s751_s23, 1  ;;  %p752_p5 = scmp.ge.s32.totalorder %s1104_s21, 1 }
   0x9   : > { %p1177_p4 = por %p1407_p1, %p42_p0  ;;  %p163_p7 = scmp.lt.s32.totalorder %s1104_s21, 3 }
   0xa   : > { %p1182_p6 = por %p156_p3, %p42_p0  ;;  %s1106_s27 = smov [#allocation5]  }
   0xb   : > { %s1410_s24 = scalar_select %p1177_p4, 1, 0 }
   0xc   : > { %s1411_s25 = scalar_select %p1182_p6, 1, 0 }
   0xd   : > { %p1187_p8 = pnand %p752_p5, %p163_p7  ;;  %s175_s28 = sshll.u32 %s1106_s27, 4  ;;  %s1191_s28 = int_to_ptr.vmem [resolvable:$true] %s175_s28 }
   0xe   : > { %s1107_s30 = smov [#allocation7]   ;;  %s948_s9 = scalar_lea.hbm %s1402_s1, 2048 }
   0xf   : > { %p838_p9 = pneg %p1187_p8  ;;  %s191_s6 = sshll.u32 %s1107_s30, 4  ;;  %s1202_s6 = int_to_ptr.vmem [resolvable:$true] %s191_s6 }
  0x10   : > { %p949_p12 = scmp.ne.s32.totalorder %s1402_s1, %s948_s9  ;;  %p955_p5 = scmp.lt.u32.totalorder %s948_s9, %s1402_s1 }
  0x11   : > { %p1198_p11 = pnand %p838_p9, %p1407_p1 }
  0x13   : > { %p950_p13 = pneg %p1198_p11 }
  0x15   : > { %p951_p0 = pnand %p950_p13, %p949_p12 }
  0x17   : > { %p952_p3 = pneg %p951_p0 }
  0x19   : > { %p957_p7 = pnand %p955_p5, %p952_p3 }
  0x1b   : > { %960 = shalt.err (!%p957_p7)
}
  0x1c   : > { %s961_s14 = scalar_lea.vmem %s1191_s28, 2048  ;;  %p969_p2 = scmp.lt.s32.totalorder %s1191_s28, %s1191_s28 }
  0x1d   : > { %p962_p9 = scmp.ne.s32.totalorder %s1191_s28, %s961_s14  ;;  %p970_p12 = scmp.lt.s32.totalorder %s961_s14, %s961_s14 }
  0x1f   : > { %p964_p10 = pnand %p962_p9, %p950_p13  ;;  %p971_p0 = por %p970_p12, %p969_p2 }
  0x21   : > { %p965_p1 = pneg %p964_p10 }
  0x23   : > { %p972_p6 = pnand %p971_p0, %p965_p1 }
  0x25   : > { %975 = shalt.err (!%p972_p6)
}
  0x26   : > { %s1108_s15 = smov 128   ;;  %s1109_s16 = smov 8  }
  0x27   : > { %841 = dma.hbm_to_vmem [thread:$0]  (!%p1198_p11), %s1402_s1, 2048, %s1191_s28, [#allocation6], %s1108_s15, %s1108_s15, %s1109_s16  }
  0x28   : > { %s976_s7 = scalar_lea.hbm %s1404_s3, 2048 }
  0x29   : > { %p977_p1 = scmp.ne.s32.totalorder %s1404_s3, %s976_s7  ;;  %p983_p10 = scmp.lt.u32.totalorder %s976_s7, %s1404_s3 }
  0x2b   : > { %p979_p2 = pnand %p977_p1, %p950_p13 }
  0x2d   : > { %p980_p6 = pneg %p979_p2 }
  0x2f   : > { %p985_p3 = pnand %p983_p10, %p980_p6 }
  0x31   : > { %988 = shalt.err (!%p985_p3)
}
  0x32   : > { %s989_s28 = scalar_lea.vmem %s1202_s6, 2048  ;;  %p997_p12 = scmp.lt.s32.totalorder %s1202_s6, %s1202_s6 }
  0x33   : > { %p990_p5 = scmp.ne.s32.totalorder %s1202_s6, %s989_s28  ;;  %p998_p0 = scmp.lt.s32.totalorder %s989_s28, %s989_s28 }
  0x35   : > { %p992_p7 = pnand %p990_p5, %p950_p13  ;;  %p999_p1 = por %p998_p0, %p997_p12 }
  0x37   : > { %p993_p9 = pneg %p992_p7 }
  0x39   : > { %p1000_p2 = pnand %p999_p1, %p993_p9 }
  0x3b   : > { %1003 = shalt.err (!%p1000_p2)
}
  0x3c   : > { %s1110_s12 = smov 64   ;;  %s1111_s13 = smov 4  }
  0x3d   : > { %844 = dma.hbm_to_vmem [thread:$0]  (!%p1198_p11), %s1404_s3, 2048, %s1202_s6, [#allocation6], %s1110_s12, %s1110_s12, %s1111_s13  }
  0x3e   : > { %s1260_s23 = sadd.s32 1, %s1104_s21   ;;  %s29_s30 = sadd.s32 1, %s1100_s20 }
  0x3f   : > { %s26_s27 = ssub.s32 %s1104_s21, %s1260_s23  ;;  %p36_p6 = scmp.ne.s32.totalorder %s1100_s20, %s1096_s19 }
  0x40   : > { %p27_p13 = scmp.eq.s32.totalorder %s26_s27, 0  ;;  %p37_p10 = scmp.eq.s32.totalorder %s1104_s21, 0 }
  0x41   : > { %p1414_p5 = scmp.eq.s32.totalorder %s1168_s22, 1  ;;  %p855_p9 = scmp.lt.s32.totalorder %s1104_s21, 2 }
  0x42   : > { %s1269_s7 = scalar_select %p27_p13, %s1100_s20, %s29_s30  }
  0x43   : > { %p38_p3 = por %p37_p10, %p36_p6  ;;  %p1273_p7 = por %p1414_p5, %p36_p6 }
  0x44   : > { %s208_s29 = sand.u32 1, %s1100_s20   ;;  %s802_s6 = sshll.u32 %s1104_s21, 8 }
  0x45   : > { %s1415_s8 = scalar_select %p1273_p7, 1, 0 }
  0x46   : > { %s756_s9 = sshll.u32 %s208_s29, 4  ;;  %s1283_s28 = scalar_lea.hbm %s1401_s0, %s802_s6 }
  0x47   : > { %s212_s12 = scalar_lea.vmem [#allocation2], %s756_s9  ;;  %p1287_p11 = pnand %p855_p9, %p38_p3 }
  0x48   : > { %s219_s13 = sshll.u32 %s212_s12, 4  ;;  %s1291_s17 = scalar_lea.sflag [#allocation3], %s208_s29  ;;  %s1285_s13 = int_to_ptr.vmem [resolvable:$true] %s219_s13 }
  0x49   : > { %s1004_s27 = scalar_lea.hbm %s1283_s28, 256  ;;  %p1006_p0 = pneg %p1287_p11 }
  0x4a   : > { %p1005_p12 = scmp.ne.s32.totalorder %s1283_s28, %s1004_s27  ;;  %s1009_s6 = scalar_lea.hbm %s1401_s0, 512 }
  0x4b   : > { %p1010_p13 = scmp.lt.u32.totalorder %s1283_s28, %s1401_s0  ;;  %p1011_p6 = scmp.lt.u32.totalorder %s1009_s6, %s1004_s27 }
  0x4c   : > { %p1007_p1 = pnand %p1006_p0, %p1005_p12  ;;  %p1013_p3 = scmp.lt.u32.totalorder %s1004_s27, %s1283_s28 }
  0x4d   : > { %p1012_p10 = por %p1011_p6, %p1010_p13 }
  0x4e   : > { %p1008_p2 = pneg %p1007_p1 }
  0x4f   : > { %p1014_p5 = por %p1013_p3, %p1012_p10 }
  0x51   : > { %p1015_p9 = pnand %p1014_p5, %p1008_p2 }
  0x53   : > { %1018 = shalt.err (!%p1015_p9)
}
  0x54   : > { %s1019_s29 = scalar_lea.vmem %s1285_s13, 256  ;;  %s1112_s12 = smov [#allocation2]  }
  0x55   : > { %p1020_p12 = scmp.ne.s32.totalorder %s1285_s13, %s1019_s29  ;;  %s1024_s30 = sshll.u32 %s1112_s12, 4  ;;  %s1025_s30 = int_to_ptr.vmem [resolvable:$false] %s1024_s30 }
  0x56   : > { %s1026_s9 = scalar_lea.vmem %s1025_s30, 512  ;;  %p1027_p4 = scmp.lt.s32.totalorder %s1285_s13, %s1025_s30 }
  0x57   : > { %p1022_p1 = pnand %p1020_p12, %p1006_p0  ;;  %p1028_p13 = scmp.lt.s32.totalorder %s1026_s9, %s1019_s29 }
  0x59   : > { %p1023_p7 = pneg %p1022_p1  ;;  %p1029_p6 = por %p1028_p13, %p1027_p4 }
  0x5b   : > { %p1030_p10 = pnand %p1029_p6, %p1023_p7 }
  0x5d   : > { %1033 = shalt.err (!%p1030_p10)
}
  0x5e   : > { %848 = dma.hbm_to_vmem [thread:$0]  (!%p1287_p11), %s1283_s28, 256, %s1285_s13, %s1291_s17, %s1108_s15, %s1108_s15, %s1109_s16  }
  0x5f   : > { %231 = sbr.rel (%p1187_p8) target bundleno = 620 (0x26c), region = 40  ;;  %s1325_s27 = sand.u32 (!%p1187_p8), 1, %s1096_s19  }
  0x60   : > { %s760_s6 = sshll.u32 (!%p1187_p8), %s1325_s27, 4  ;;  %s234_s10 = scalar_lea.sflag (!%p1187_p8), [#allocation3], %s1325_s27 }
  0x61   : > { %s1331_s14 = scalar_lea.vmem (!%p1187_p8), [#allocation2], %s760_s6  ;;  %p1417_p4 = scmp.ne.s32.totalorder (!%p1187_p8), %s1410_s24, 0 }
  0x66   : > { %1079 = dma.done.wait (%p1417_p4), %s234_s10, 256  }
  0x67   : > { %1081 = vsyncadd (%p1417_p4), %s234_s10, 4294967040  ;;  %p1418_p7 = scmp.eq.s32.totalorder %s1168_s22, 0 }
  0x69   : > { %1083 = dma.done.wait (%p1418_p7), [#allocation6], 4096   ;;  %p1419_p8 = pmov %p1418_p7 }
  0x6a   : > { %v1113_v0 = vmov 0   ;;  %v900_v1 = vld [vmem:[#allocation5 + $0x4] ss:$8 sps:$4 sm:$0xff]   ;;  %v902_v2 = vld [vmem:[#allocation5] ss:$8 sps:$4 sm:$0xff]   ;;  %v928_v24 = vld [vmem:[#allocation7 + $0x50] sm:$0xff]   ;;  %v296_v36 = vlaneseq }
  0x6b   : > { %1085 = vsyncadd (%p1419_p8), [#allocation6], 4294963200  ;;  %418 = vmatprep.mubr.bf16.mxu0 %v1113_v0  ;;  %386 = vmatprep.subr.bf16.mxu0 %v900_v1  ;;  %v903_v3 = vld [vmem:[#allocation5 + $0x14] ss:$8 sps:$4 sm:$0xff]   ;;  %v905_v4 = vld [vmem:[#allocation5 + $0x10] ss:$8 sps:$4 sm:$0xff]  }
  0x6c   : > { %387 = vmatpush1.bf16.msra.mxu0 %v902_v2  ;;  %v906_v5 = vld [vmem:[#allocation5 + $0x24] ss:$8 sps:$4 sm:$0xff]   ;;  %v908_v6 = vld [vmem:[#allocation5 + $0x20] ss:$8 sps:$4 sm:$0xff]   ;;  %v909_v7 = vld [vmem:[#allocation5 + $0x34] ss:$8 sps:$4 sm:$0xff]  }
  0x6d   : > { %388 = vmatprep.subr.bf16.mxu0 %v903_v3  ;;  %v911_v8 = vld [vmem:[#allocation5 + $0x30] ss:$8 sps:$4 sm:$0xff]   ;;  %v912_v9 = vld [vmem:[#allocation5 + $0x44] ss:$8 sps:$4 sm:$0xff]   ;;  %v914_v10 = vld [vmem:[#allocation5 + $0x40] ss:$8 sps:$4 sm:$0xff]  }
  0x6e   : > { %v915_v11 = vld [vmem:[#allocation5 + $0x54] ss:$8 sps:$4 sm:$0xff]   ;;  %v917_v12 = vld [vmem:[#allocation5 + $0x50] ss:$8 sps:$4 sm:$0xff]   ;;  %v918_v13 = vld [vmem:[#allocation5 + $0x64] ss:$8 sps:$4 sm:$0xff]  }
  0x6f   : > { %v920_v14 = vld [vmem:[#allocation5 + $0x60] ss:$8 sps:$4 sm:$0xff]   ;;  %v921_v15 = vld [vmem:[#allocation5 + $0x74] ss:$8 sps:$4 sm:$0xff]   ;;  %v923_v16 = vld [vmem:[#allocation5 + $0x70] ss:$8 sps:$4 sm:$0xff]  }
  0x70   : > { %389 = vmatpush1.bf16.msra.mxu0 %v905_v4  ;;  %v275_v17 = vld [vmem:[%s1331_s14] sm:$0xff]  ;;  %v276_v18 = vld [vmem:[%s1331_s14 + $0x8] sm:$0xff]  ;;  %v297_v37 = vshrl.u32 %v296_v36, 7  ;;  %s271_s28 = scalar_lea.vmem [#allocation8], %s760_s6  ;;  %s803_s17 = sshll.u32 %s1168_s22, 8 }
  0x71   : > { %390 = vmatprep.subr.bf16.mxu0 %v906_v5  ;;  %v277_v19 = vpack.c.bf16 %v276_v18, %v275_v17  ;;  %v924_v20 = vld [vmem:[#allocation7 + $0x40] sm:$0xff]   ;;  %v926_v22 = vld [vmem:[#allocation7 + $0x48] sm:$0xff]   ;;  %v929_v25 = vld [vmem:[#allocation7 + $0x10] sm:$0xff]   ;;  %s659_s13 = sshll.u32 %s271_s28, 4  ;;  %s1357_s12 = scalar_lea.hbm %s1406_s5, %s803_s17  ;;  %s1352_s13 = int_to_ptr.vmem [resolvable:$true] %s659_s13 }
  0x72   : > { %v925_v21 = vld [vmem:[#allocation7] sm:$0xff]   ;;  %804 = vmatprep.subr.bf16.mxu1 %v924_v20  ;;  %v927_v23 = vld [vmem:[#allocation7 + $0x8] sm:$0xff]   ;;  %v930_v26 = vld [vmem:[#allocation7 + $0x58] sm:$0xff]   ;;  %v298_v38 = vsub.s32 0, %v297_v37  ;;  %v302_v40 = vsub.s32 1, %v297_v37  ;;  %s646_s30 = scalar_lea.sflag [#allocation4], %s1325_s27 }
  0x73   : > { %805 = vmatpush3.bf16.msra.mxu1 %v925_v21  ;;  %v931_v27 = vld [vmem:[#allocation7 + $0x18] sm:$0xff]   ;;  %v932_v28 = vld [vmem:[#allocation7 + $0x60] sm:$0xff]   ;;  %v934_v30 = vld [vmem:[#allocation7 + $0x68] sm:$0xff]   ;;  %s1034_s9 = scalar_lea.vmem %s1352_s13, 256  ;;  %p1420_p0 = scmp.ne.s32.totalorder %s1415_s8, 0 }
  0x74   : > { %391 = vmatpush1.bf16.msra.mxu0 %v908_v6  ;;  %806 = vmatprep.subr.bf16.mxu1 %v926_v22  ;;  %v933_v29 = vld [vmem:[#allocation7 + $0x20] sm:$0xff]   ;;  %v935_v31 = vld [vmem:[#allocation7 + $0x28] sm:$0xff]   ;;  %v936_v32 = vld [vmem:[#allocation7 + $0x70] sm:$0xff]   ;;  %p1035_p11 = scmp.ne.s32.totalorder %s1352_s13, %s1034_s9  ;;  %s1114_s22 = smov [#allocation8]  }
  0x75   : > { %392 = vmatprep.subr.bf16.mxu0 %v909_v7  ;;  %v937_v33 = vld [vmem:[#allocation7 + $0x30] sm:$0xff]   ;;  %v938_v34 = vld [vmem:[#allocation7 + $0x78] sm:$0xff]   ;;  %v294_v39 = vld [vmem:[%s1403_s2] sm:$0x3]  ;;  %s1038_s6 = sshll.u32 %s1114_s22, 4  ;;  %s1039_s6 = int_to_ptr.vmem [resolvable:$false] %s1038_s6 }
  0x76   : > { %v939_v35 = vld [vmem:[#allocation7 + $0x38] sm:$0xff]   ;;  %v299_v41 = vrot.slane %v294_v39, %v298_v38  ;;  %v303_v42 = vrot.slane %v294_v39, %v302_v40  ;;  %p1036_p2 = pnand %p1035_p11, %p1420_p0  ;;  %s1040_s10 = scalar_lea.vmem %s1039_s6, 512 }
  0x77   : > { %807 = vmatpush3.bf16.msra.mxu1 %v927_v23  ;;  %p1041_p5 = scmp.lt.s32.totalorder %s1352_s13, %s1039_s6  ;;  %p1042_p9 = scmp.lt.s32.totalorder %s1040_s10, %s1034_s9 }
  0x78   : > { %393 = vmatpush1.bf16.msra.mxu0 %v911_v8  ;;  %808 = vmatprep.subr.bf16.mxu1 %v928_v24  ;;  %p1037_p3 = pneg %p1036_p2 }
  0x79   : > { %394 = vmatprep.subr.bf16.mxu0 %v912_v9  ;;  %p1043_p12 = por %p1042_p9, %p1041_p5 }
  0x7b   : > { %809 = vmatpush3.bf16.msra.mxu1 %v929_v25  ;;  %p1044_p1 = pnand %p1043_p12, %p1037_p3 }
  0x7c   : > { %395 = vmatpush1.bf16.msra.mxu0 %v914_v10  ;;  %810 = vmatprep.subr.bf16.mxu1 %v930_v26  ;;  %v780_v26 = vld [vmem:[%s1405_s4] ss:$0 sm:$0xff] }
  0x7d   : > { %396 = vmatprep.subr.bf16.mxu0 %v915_v11 }
  0x7f   : > { %811 = vmatpush3.bf16.msra.mxu1 %v931_v27 }
  0x80   : > { %397 = vmatpush1.bf16.msra.mxu0 %v917_v12  ;;  %812 = vmatprep.subr.bf16.mxu1 %v932_v28 }
  0x81   : > { %398 = vmatprep.subr.bf16.mxu0 %v918_v13 }
  0x83   : > { %813 = vmatpush3.bf16.msra.mxu1 %v933_v29 }
  0x84   : > { %399 = vmatpush1.bf16.msra.mxu0 %v920_v14  ;;  %814 = vmatprep.subr.bf16.mxu1 %v934_v30 }
  0x85   : > { %400 = vmatprep.subr.bf16.mxu0 %v921_v15 }
  0x87   : > { %815 = vmatpush3.bf16.msra.mxu1 %v935_v31 }
  0x88   : > { %401 = vmatpush1.bf16.msra.mxu0 %v923_v16  ;;  %816 = vmatprep.subr.bf16.mxu1 %v936_v32 }
  0x8b   : > { %419 = vmatmul.mubr.bf16.vlgmr.msra.gmra.mrb[0].mxu0 %v277_v19  ;;  %817 = vmatpush3.bf16.msra.mxu1 %v937_v33 }
  0x8c   : > { %818 = vmatprep.subr.bf16.mxu1 %v938_v34 }
  0x8f   : > { %819 = vmatpush3.bf16.msra.mxu1 %v939_v35 }
 0x15e   : > { %v420_v43 = vpop.f32.mrb[0].mxu0 }
 0x15f   : > { %v421_v44 = vadd.f32 %v420_v43, %v299_v41  ;;  %v422_v45 = vpop.f32.mrb[1].mxu0 }
 0x160   : > { %v423_v46 = vadd.f32 %v422_v45, %v303_v42  ;;  %v424_v47 = vpop.f32.mrb[2].mxu0 }
 0x161   : > { %v429_v48 = vmul.f32 %v421_v44, %v421_v44  ;;  %v425_v49 = vadd.f32 %v424_v47, %v299_v41  ;;  %v426_v50 = vpop.f32.mrb[3].mxu0 }
 0x162   : > { %v430_v51 = vmul.f32 %v423_v46, %v423_v46  ;;  %v427_v52 = vadd.f32 %v426_v50, %v303_v42 }
 0x163   : > { %v433_v53 = vmul.f32 %v429_v48, %v421_v44  ;;  %v431_v54 = vmul.f32 %v425_v49, %v425_v49 }
 0x164   : > { %v434_v55 = vmul.f32 %v430_v51, %v423_v46  ;;  %v432_v56 = vmul.f32 %v427_v52, %v427_v52 }
 0x165   : > { %v437_v57 = vmul.f32 0.044715, %v433_v53  ;;  %v435_v58 = vmul.f32 %v431_v54, %v425_v49 }
 0x166   : > { %v438_v59 = vmul.f32 0.044715, %v434_v55  ;;  %v436_v60 = vmul.f32 %v432_v56, %v427_v52 }
 0x167   : > { %v441_v61 = vadd.f32 %v437_v57, %v421_v44  ;;  %v439_v62 = vmul.f32 0.044715, %v435_v58 }
 0x168   : > { %v440_v63 = vmul.f32 0.044715, %v436_v60  ;;  %v442_v0 = vadd.f32 %v438_v59, %v423_v46 }
 0x169   : > { %v445_v1 = vmul.f32 0.7978846, %v441_v61  ;;  %v443_v2 = vadd.f32 %v439_v62, %v425_v49 }
 0x16a   : > { %v444_v3 = vadd.f32 %v440_v63, %v427_v52  ;;  %v446_v4 = vmul.f32 0.7978846, %v442_v0 }
 0x16b   : > { %940 = vtanh.f32 %v445_v1  ;;  %v447_v5 = vmul.f32 0.7978846, %v443_v2 }
 0x16c   : > { %v448_v6 = vmul.f32 0.7978846, %v444_v3  ;;  %942 = vtanh.f32 %v446_v4 }
 0x16d   : > { %944 = vtanh.f32 %v447_v5 }
 0x16e   : > { %946 = vtanh.f32 %v448_v6 }
 0x175   : > { %v941_v7 = vpop.eup %940 }
 0x176   : > { %v943_v8 = vpop.eup %942  ;;  %v453_v9 = vadd.f32 1.0, %v941_v7 }
 0x177   : > { %v945_v10 = vpop.eup %944  ;;  %v454_v11 = vadd.f32 1.0, %v943_v8 }
 0x178   : > { %v947_v12 = vpop.eup %946  ;;  %v455_v13 = vadd.f32 1.0, %v945_v10  ;;  %v457_v14 = vmul.f32 0.5, %v453_v9 }
 0x179   : > { %v456_v15 = vadd.f32 1.0, %v947_v12  ;;  %v458_v16 = vmul.f32 0.5, %v454_v11 }
 0x17a   : > { %v459_v17 = vmul.f32 0.5, %v455_v13  ;;  %v461_v19 = vmul.f32 %v457_v14, %v421_v44 }
 0x17b   : > { %v460_v18 = vmul.f32 0.5, %v456_v15  ;;  %v462_v21 = vmul.f32 %v458_v16, %v423_v46 }
 0x17c   : > { %v463_v20 = vmul.f32 %v459_v17, %v425_v49 }
 0x17d   : > { %v464_v22 = vmul.f32 %v460_v18, %v427_v52 }
 0x17e   : > { %v465_v23 = vpack.c.bf16 %v463_v20, %v461_v19 }
 0x17f   : > { %v466_v24 = vpack.c.bf16 %v464_v22, %v462_v21 }
 0x181   : > { %634 = vmatprep.mubr.bf16.mxu1 %v466_v24 }
 0x182   : > { %635 = vmatmul.mubr.bf16.vlgmr.msra.gmra.mrb[0].mxu1 %v465_v23 }
 0x255   : > { %v820_v25 = vpop.f32.mrb[0].mxu1 }
 0x256   : > { %v821_v27 = vpop.f32.mrb[1].mxu1 }
 0x257   : > { %v822_v28 = vadd.f32 %v821_v27, %v820_v25  ;;  %v823_v29 = vpop.f32.mrb[2].mxu1 }
 0x258   : > { %v824_v30 = vpop.f32.mrb[3].mxu1 }
 0x259   : > { %v637_v31 = vadd.f32 %v822_v28, %v780_v26  ;;  %v825_v32 = vadd.f32 %v824_v30, %v823_v29 }
 0x25b   : > { %643 = vst [vmem:[%s271_s28] sm:$0xff] %v637_v31  ;;  %v640_v33 = vadd.f32 %v825_v32, %v780_v26 }
 0x25d   : > { %644 = vst [vmem:[%s271_s28 + $0x8] sm:$0xff] %v640_v33 }
 0x25e   : > { %1047 = shalt.err (!%p1044_p1)
}
 0x25f   : > { %s1048_s14 = scalar_lea.hbm %s1357_s12, 256  ;;  %s1052_s15 = scalar_lea.hbm %s1406_s5, 512 }
 0x260   : > { %p1049_p13 = scmp.ne.s32.totalorder %s1357_s12, %s1048_s14  ;;  %p1053_p4 = scmp.lt.u32.totalorder %s1357_s12, %s1406_s5 }
 0x261   : > { %p1054_p7 = scmp.lt.u32.totalorder %s1052_s15, %s1048_s14  ;;  %p1056_p11 = scmp.lt.u32.totalorder %s1048_s14, %s1357_s12 }
 0x262   : > { %p1050_p6 = pnand %p1049_p13, %p1420_p0 }
 0x263   : > { %p1055_p8 = por %p1054_p7, %p1053_p4 }
 0x264   : > { %p1051_p10 = pneg %p1050_p6 }
 0x265   : > { %p1057_p2 = por %p1056_p11, %p1055_p8 }
 0x267   : > { %p1058_p3 = pnand %p1057_p2, %p1051_p10 }
 0x269   : > { %1061 = shalt.err (!%p1058_p3)
}
 0x26a   : > { %s1115_s17 = smov 128   ;;  %s1116_s11 = smov 8  }
 0x26b   : > { %836 = dma.vmem_to_hbm [thread:$0]  (%p1420_p0), %s1352_s13, 256, %s1357_s12, %s646_s30, %s1115_s17, %s1115_s17, %s1116_s11  }
 0x26c PF: > { %s674_s29 = sand.u32 1, %s1092_s18   ;;  %p1421_p5 = scmp.ne.s32.totalorder %s1411_s25, 0 }
 0x26d   : > { %p1422_p9 = scmp.ge.s32.totalorder %s1104_s21, 2  ;;  %s675_s9 = scalar_lea.sflag [#allocation4], %s674_s29 }
 0x26f   : > { %p850_p12 = pnand %p1422_p9, %p1421_p5 }
 0x271   : > { %1087 = dma.done.wait (!%p850_p12), %s675_s9, 256  }
 0x272   : > { %1089 = vsyncadd (!%p850_p12), %s675_s9, 4294967040  ;;  %p19_p1 = scmp.ge.s32.totalorder %s1260_s23, 4   ;;  %s1423_s18 = smov %s1096_s19 }
 0x273   : > { %s1424_s19 = smov %s1100_s20  ;;  %s1425_s20 = smov %s1269_s7 }
 0x274   : > { %s1426_s21 = smov %s1260_s23  ;;  %21 = sbr.rel (!%p19_p1) target bundleno = 6 (0x6), region = 93 }
 0x27b   :  { %680 = vsyncpa [#allocation3], 1 }
 0x27c   :  { %682 = vsyncpa [#allocation3 + $0x1], 1 }
 0x27d   :  { %683 = vsyncpa [#allocation6], 1 }
 0x27e   :  { %684 = vsyncpa [#allocation4], 1 }
 0x27f   :  { %686 = vsyncpa [#allocation4 + $0x1], 1 }

</bundles_post_ra>
